<compile_context>
chip_gen: v7x
topology: tpu7x:2x2x1
jax: 0.10.0
libtpu: 0.0.40
codegen_flags: <defaults>
</compile_context>

<pallas_src>
import functools
import math

import jax
import jax.numpy as jnp
from jax.experimental import pallas as pl
from jax.experimental.pallas import tpu as pltpu


def _round_up(v, m):
    return (v + m - 1) // m * m


def uhg_sage_kernel(a_ref, xk_ref, xi_ref, inv_ref, ws_ref, wa_ref, b_ref,
                    o_ref, acc_ref, *, d_out, tk, xk_resident):
    k = pl.program_id(1)

    @pl.when(k == 0)
    def _():
        acc_ref[...] = jnp.zeros_like(acc_ref)

    # scatter_mean numerator: (edge-count adjacency) @ x, accumulated over the
    # k tiles.  int8 counts -> bf16 is exact; accumulation is f32.
    a = a_ref[...].astype(jnp.bfloat16)
    if xk_resident:
        xk = xk_ref[pl.ds(pl.multiple_of(k * tk, tk), tk), :]
    else:
        xk = xk_ref[...]
    acc_ref[...] += jnp.dot(a, xk, preferred_element_type=jnp.float32)

    @pl.when(k == pl.num_programs(1) - 1)
    def _():
        # scatter_mean denominator: exact f32 1/deg (count==0 -> 1).
        agg = acc_ref[...] * inv_ref[...]                    # [TM, Din_p] f32

        # linear(cat([x, agg], dim=1)) == x @ W_self + agg @ W_agg + b
        h = (jnp.dot(xi_ref[...], ws_ref[...], preferred_element_type=jnp.float32)
             + jnp.dot(agg.astype(jnp.bfloat16), wa_ref[...],
                       preferred_element_type=jnp.float32)
             + b_ref[...])
        h = jnp.maximum(h, 0.0)                              # ReLU
        # (padded lanes of W / b are zero -> h is zero there.)

        col = jax.lax.broadcasted_iota(jnp.int32, h.shape, 1)
        feat_col = col < d_out                               # real feature lanes

        # append_uhg: homogeneous coordinate == 1 -> sign == 1.
        # uhg_normalize: norm = sqrt(clamp(sum(f^2) - hom^2, 1e-8))
        uhg = jnp.sum(h * h, axis=-1, keepdims=True) - 1.0
        f = h * jax.lax.rsqrt(jnp.maximum(uhg, 1e-8))

        # normalize_points: zero-row handling + L2 normalization of features.
        zero_mask = jnp.all(f == 0.0, axis=-1, keepdims=True)
        f = jnp.where(jnp.logical_and(zero_mask, feat_col), 1.0, f)
        l2sq = jnp.sum(f * f, axis=-1, keepdims=True)
        nf = f * jax.lax.rsqrt(jnp.maximum(l2sq, 1e-16))     # == f / clamp(||f||, 1e-8)

        # Lane-dense store: features in lanes [0, d_out), homogeneous 1.0 at
        # lane d_out, zeros in the remaining padded lanes.
        o_ref[...] = jnp.where(col == d_out, 1.0, nf)


def uhg_sage_conv(x, edge_index, weight, bias, *, tm=512, tk=512):
    """x: [N, Din] f32, edge_index: [2, E] int32, weight: [Dout, 2*Din], bias: [Dout]."""
    n, d_in = x.shape
    d_out = weight.shape[0]

    d_in_p = _round_up(d_in, 128)
    d_out_p = _round_up(d_out + 1, 128)          # features + homogeneous lane

    # --- tile / padding derivation -----------------------------------------
    tm = max(128, (tm // 128) * 128)
    tk = max(128, (tk // 128) * 128)
    n_p = _round_up(n, 128)
    tm = min(tm, n_p)
    tk = min(tk, n_p)
    lcm = tm * tk // math.gcd(tm, tk)
    n_p = _round_up(n_p, lcm)

    # v7x megacore: ensure >= 2 blocks on the "parallel" row axis when the
    # padded problem allows it, so both TensorCores get work.
    if tm == n_p and n_p >= 256:
        cand = ((n_p // 2) // 128) * 128
        while cand >= 128 and n_p % cand:
            cand -= 128
        if cand >= 128:
            tm = cand

    # Keep x fully VMEM-resident across the grid when small enough (kills the
    # (N/TM)-fold HBM re-stream of the aggregation operand).
    xk_resident = (n_p * d_in_p * 2) <= (4 << 20)

    src, tgt = edge_index[0], edge_index[1]

    # Glue: adjacency as raw int8 edge counts (single scatter in the compact
    # dtype); padded rows/cols stay zero.  NOTE: assumes per-(tgt,src) edge
    # multiplicity <= 127.
    adj = jnp.zeros((n_p, n_p), jnp.int8).at[tgt, src].add(
        jnp.ones_like(src, jnp.int8))

    # Exact f32 1/deg (count[count == 0] = 1), applied in the epilogue.
    cnt = jnp.zeros((n_p,), jnp.float32).at[tgt].add(1.0)
    inv_cnt = jnp.where(cnt == 0.0, 1.0, 1.0 / cnt).reshape(n_p, 1)

    # Zero-padded, lane-dense bf16 operands; linear weight split so the
    # in-kernel concat is avoided (cat([x, agg]) @ W.T == x @ Ws + agg @ Wa).
    x_p = (jnp.zeros((n_p, d_in_p), jnp.float32).at[:n, :d_in].set(x)
           .astype(jnp.bfloat16))
    w_self = (jnp.zeros((d_in_p, d_out_p), jnp.float32)
              .at[:d_in, :d_out].set(weight[:, :d_in].T).astype(jnp.bfloat16))
    w_agg = (jnp.zeros((d_in_p, d_out_p), jnp.float32)
             .at[:d_in, :d_out].set(weight[:, d_in:].T).astype(jnp.bfloat16))
    b = jnp.zeros((1, d_out_p), jnp.float32).at[0, :d_out].set(bias)

    grid = (n_p // tm, n_p // tk)

    if xk_resident:
        xk_spec = pl.BlockSpec((n_p, d_in_p), lambda i, k: (0, 0))
    else:
        xk_spec = pl.BlockSpec((tk, d_in_p), lambda i, k: (k, 0))

    # VMEM footprint (double-buffered inputs/outputs + f32 scratch) -> set an
    # explicit limit so big tiles are legal on v5e's 16 MiB scoped default and
    # never exceed v7x's 64 MiB physical VMEM.
    vmem_bytes = (
        2 * tm * tk * 1                                     # int8 A tiles
        + 2 * (n_p if xk_resident else tk) * d_in_p * 2     # x (aggregation)
        + 2 * tm * d_in_p * 2                               # x (self term)
        + 2 * tm * 128 * 4                                  # 1/deg (lane-padded)
        + 4 * d_in_p * d_out_p * 2                          # W_self + W_agg
        + 2 * 8 * 128 * 4                                   # bias
        + 2 * tm * d_out_p * 4                              # output tiles
        + tm * d_in_p * 4)                                  # acc scratch
    vmem_limit = min(max(vmem_bytes + (2 << 20), 16 << 20), 48 << 20)

    flops = 2 * n_p * n_p * d_in_p + 4 * n_p * d_in_p * d_out_p
    bytes_accessed = (
        n_p * n_p                                           # int8 adjacency
        + (1 if xk_resident else grid[0]) * n_p * d_in_p * 2
        + n_p * d_in_p * 2 + n_p * 4
        + 2 * d_in_p * d_out_p * 2 + d_out_p * 4
        + n_p * d_out_p * 4)

    out = pl.pallas_call(
        functools.partial(uhg_sage_kernel, d_out=d_out, tk=tk,
                          xk_resident=xk_resident),
        out_shape=jax.ShapeDtypeStruct((n_p, d_out_p), jnp.float32),
        grid_spec=pltpu.PrefetchScalarGridSpec(
            num_scalar_prefetch=0,
            grid=grid,
            in_specs=[
                pl.BlockSpec((tm, tk), lambda i, k: (i, k)),           # A (int8)
                xk_spec,                                               # x for A@x
                pl.BlockSpec((tm, d_in_p), lambda i, k: (i, 0)),       # x (self)
                pl.BlockSpec((tm, 1), lambda i, k: (i, 0)),            # 1/deg f32
                pl.BlockSpec((d_in_p, d_out_p), lambda i, k: (0, 0)),  # W_self
                pl.BlockSpec((d_in_p, d_out_p), lambda i, k: (0, 0)),  # W_agg
                pl.BlockSpec((1, d_out_p), lambda i, k: (0, 0)),       # bias
            ],
            out_specs=pl.BlockSpec((tm, d_out_p), lambda i, k: (i, 0)),
            scratch_shapes=[pltpu.VMEM((tm, d_in_p), jnp.float32)],    # agg acc
        ),
        compiler_params=pltpu.CompilerParams(
            dimension_semantics=("parallel", "arbitrary"),
            vmem_limit_bytes=vmem_limit),
        cost_estimate=pl.CostEstimate(
            flops=flops, transcendentals=2 * n_p, bytes_accessed=bytes_accessed),
    )(adj, x_p, x_p, inv_cnt, w_self, w_agg, b)

    return out[:n, :d_out + 1]


def uhg_sage_ref(x, edge_index, weight, bias):
    """Pure-JAX reference mirroring the PyTorch forward, for a sanity check."""
    src, tgt = edge_index[0], edge_index[1]
    n = x.shape[0]
    sf = x[src]
    agg = jax.ops.segment_sum(sf, tgt, num_segments=n)
    cnt = jax.ops.segment_sum(jnp.ones((sf.shape[0],), x.dtype), tgt, num_segments=n)
    cnt = jnp.where(cnt == 0, 1.0, cnt)
    agg = agg / cnt[:, None]
    out = jnp.dot(jnp.concatenate([x, agg], axis=1), weight.T,
                  precision=jax.lax.Precision.HIGHEST) + bias
    out = jnp.maximum(out, 0.0)
    out = jnp.concatenate([out, jnp.ones((n, 1), x.dtype)], axis=1)
    # uhg_normalize
    feat, hom = out[:, :-1], out[:, -1:]
    norm = jnp.sqrt(jnp.maximum(jnp.sum(feat ** 2, -1, keepdims=True) - hom ** 2, 1e-8))
    feat = feat / norm
    hom = jnp.sign(hom) * jnp.ones_like(hom)
    out = jnp.concatenate([feat, hom], axis=1)
    # normalize_points
    feat, hom = out[:, :-1], out[:, -1:]
    zm = jnp.all(feat == 0, -1, keepdims=True)
    feat = jnp.where(zm, jnp.ones_like(feat), feat)
    l2 = jnp.linalg.norm(feat, axis=-1, keepdims=True)
    feat = feat / jnp.maximum(l2, 1e-8)
    out = jnp.concatenate([feat, hom], axis=1)
    sign = jnp.sign(out[:, -1:])
    sign = jnp.where(sign == 0, 1.0, sign)
    return out * sign


if __name__ == "__main__":
    N, E, D_IN, D_OUT = 16, 48, 8, 16

    key = jax.random.PRNGKey(0)
    k_x, k_e, k_w = jax.random.split(key, 3)

    x = jax.random.normal(k_x, (N, D_IN), jnp.float32)
    edge_index = jax.random.randint(k_e, (2, E), 0, N, jnp.int32)

    # Deterministic parameter init matching __init__ semantics:
    # orthogonal weight [D_OUT, 2*D_IN], rows L2-normalized; zero bias.
    w0 = jax.random.normal(k_w, (2 * D_IN, 2 * D_IN), jnp.float32)
    q, _ = jnp.linalg.qr(w0)
    weight = q[:D_OUT, :]
    weight = weight / jnp.maximum(
        jnp.linalg.norm(weight, axis=1, keepdims=True), 1e-8)
    bias = jnp.zeros((D_OUT,), jnp.float32)

    out = jax.block_until_ready(uhg_sage_conv(x, edge_index, weight, bias))
    ref = uhg_sage_ref(x, edge_index, weight, bias)

    assert out.shape == (N, D_OUT + 1), out.shape
    max_err = float(jnp.max(jnp.abs(out - ref)))
    assert max_err < 2e-2, f"mismatch vs reference: {max_err}"
    print("KERNEL_OK")
</pallas_src>

<mosaic_0001>
module attributes {stable_mosaic.version = 11 : i64} {
  func.func @uhg_sage_kernel(%arg0: i32, %arg1: i32, %arg2: memref<128x128xi8, #tpu.memory_space<vmem>>, %arg3: memref<128x128xbf16, #tpu.memory_space<vmem>>, %arg4: memref<128x128xbf16, #tpu.memory_space<vmem>>, %arg5: memref<128x1xf32, #tpu.memory_space<vmem>>, %arg6: memref<128x128xbf16, #tpu.memory_space<vmem>>, %arg7: memref<128x128xbf16, #tpu.memory_space<vmem>>, %arg8: memref<1x128xf32, #tpu.memory_space<vmem>>, %arg9: memref<128x128xf32, #tpu.memory_space<vmem>>, %arg10: memref<128x128xf32, #tpu.memory_space<vmem>>) attributes {dimension_semantics = [#tpu.dimension_semantics<parallel>, #tpu.dimension_semantics<arbitrary>], iteration_bounds = array<i64: 1, 1>, scalar_prefetch = 0 : i64, scratch_operands = 1 : i64, tpu.core_type = #tpu.core_type<tc>, window_params = [{transform_indices = @transform_0, window_bounds = array<i64: 128, 128>}, {pipeline_mode = #tpu.pipeline_mode<synchronous>, transform_indices = @transform_1, window_bounds = array<i64: 128, 128>}, {transform_indices = @transform_2, window_bounds = array<i64: 128, 128>}, {transform_indices = @transform_3, window_bounds = array<i64: 128, 1>}, {pipeline_mode = #tpu.pipeline_mode<synchronous>, transform_indices = @transform_4, window_bounds = array<i64: 128, 128>}, {pipeline_mode = #tpu.pipeline_mode<synchronous>, transform_indices = @transform_5, window_bounds = array<i64: 128, 128>}, {pipeline_mode = #tpu.pipeline_mode<synchronous>, transform_indices = @transform_6, window_bounds = array<i64: 1, 128>}, {transform_indices = @transform_7, window_bounds = array<i64: 128, 128>}]} {
    %c0_i32 = arith.constant 0 : i32
    %0 = arith.cmpi eq, %arg1, %c0_i32 : i32
    %1 = arith.extui %0 : i1 to i32
    %c0_i32_0 = arith.constant 0 : i32
    %2 = arith.cmpi ne, %1, %c0_i32_0 : i32
    scf.if %2 {
      %cst_9 = arith.constant 0.000000e+00 : f32
      %16 = vector.broadcast %cst_9 : f32 to vector<128x128xf32>
      %c0_10 = arith.constant 0 : index
      %c0_11 = arith.constant 0 : index
      %17 = vector.load %arg10[%c0_10, %c0_11] : memref<128x128xf32, #tpu.memory_space<vmem>>, vector<128x128xf32>
      tpu.vector_store %arg10[%c0_10, %c0_11], %16 {strides = array<i32>} : memref<128x128xf32, #tpu.memory_space<vmem>>, vector<128x128xf32>,
    } else {
    }
    %c0 = arith.constant 0 : index
    %c0_1 = arith.constant 0 : index
    %3 = vector.load %arg2[%c0, %c0_1] : memref<128x128xi8, #tpu.memory_space<vmem>>, vector<128x128xi8>
    %4 = arith.sitofp %3 : vector<128x128xi8> to vector<128x128xbf16>
    %c128_i32 = arith.constant 128 : i32
    %5 = arith.muli %arg1, %c128_i32 : i32
    %6 = tpu.assume_multiple %5, 128 : i32
    %7 = arith.index_cast %6 : i32 to index
    %c0_2 = arith.constant 0 : index
    %8 = vector.load %arg3[%7, %c0_2] : memref<128x128xbf16, #tpu.memory_space<vmem>>, vector<128x128xbf16>
    %c0_3 = arith.constant 0 : index
    %c0_4 = arith.constant 0 : index
    %9 = vector.load %arg10[%c0_3, %c0_4] : memref<128x128xf32, #tpu.memory_space<vmem>>, vector<128x128xf32>
    %cst = arith.constant dense<0.000000e+00> : vector<128x128xf32>
    %10 = tpu.matmul %4, %8, %cst {dimension_numbers = #tpu.dot_dimension_numbers<[1], [0], [0], [1], [0, 0, 1, 1], [], []>} : vector<128x128xbf16>, vector<128x128xbf16>, vector<128x128xf32> -> vector<128x128xf32>
    %11 = arith.addf %9, %10 : vector<128x128xf32>
    %c0_5 = arith.constant 0 : index
    %c0_6 = arith.constant 0 : index
    %12 = vector.load %arg10[%c0_5, %c0_6] : memref<128x128xf32, #tpu.memory_space<vmem>>, vector<128x128xf32>
    tpu.vector_store %arg10[%c0_5, %c0_6], %11 {strides = array<i32>} : memref<128x128xf32, #tpu.memory_space<vmem>>, vector<128x128xf32>,
    %c0_i32_7 = arith.constant 0 : i32
    %13 = arith.cmpi eq, %arg1, %c0_i32_7 : i32
    %14 = arith.extui %13 : i1 to i32
    %c0_i32_8 = arith.constant 0 : i32
    %15 = arith.cmpi ne, %14, %c0_i32_8 : i32
    scf.if %15 {
      %c0_9 = arith.constant 0 : index
      %c0_10 = arith.constant 0 : index
      %16 = vector.load %arg10[%c0_9, %c0_10] : memref<128x128xf32, #tpu.memory_space<vmem>>, vector<128x128xf32>
      %c0_11 = arith.constant 0 : index
      %c0_12 = arith.constant 0 : index
      %17 = vector.load %arg5[%c0_11, %c0_12] : memref<128x1xf32, #tpu.memory_space<vmem>>, vector<128x1xf32>
      %18 = vector.broadcast %17 : vector<128x1xf32> to vector<128x128xf32>
      %19 = arith.mulf %16, %18 : vector<128x128xf32>
      %c0_13 = arith.constant 0 : index
      %c0_14 = arith.constant 0 : index
      %20 = vector.load %arg4[%c0_13, %c0_14] : memref<128x128xbf16, #tpu.memory_space<vmem>>, vector<128x128xbf16>
      %c0_15 = arith.constant 0 : index
      %c0_16 = arith.constant 0 : index
      %21 = vector.load %arg6[%c0_15, %c0_16] : memref<128x128xbf16, #tpu.memory_space<vmem>>, vector<128x128xbf16>
      %cst_17 = arith.constant dense<0.000000e+00> : vector<128x128xf32>
      %22 = tpu.matmul %20, %21, %cst_17 {dimension_numbers = #tpu.dot_dimension_numbers<[1], [0], [0], [1], [0, 0, 1, 1], [], []>} : vector<128x128xbf16>, vector<128x128xbf16>, vector<128x128xf32> -> vector<128x128xf32>
      %23 = arith.truncf %19 : vector<128x128xf32> to vector<128x128xbf16>
      %c0_18 = arith.constant 0 : index
      %c0_19 = arith.constant 0 : index
      %24 = vector.load %arg7[%c0_18, %c0_19] : memref<128x128xbf16, #tpu.memory_space<vmem>>, vector<128x128xbf16>
      %cst_20 = arith.constant dense<0.000000e+00> : vector<128x128xf32>
      %25 = tpu.matmul %23, %24, %cst_20 {dimension_numbers = #tpu.dot_dimension_numbers<[1], [0], [0], [1], [0, 0, 1, 1], [], []>} : vector<128x128xbf16>, vector<128x128xbf16>, vector<128x128xf32> -> vector<128x128xf32>
      %26 = arith.addf %22, %25 : vector<128x128xf32>
      %c0_21 = arith.constant 0 : index
      %c0_22 = arith.constant 0 : index
      %27 = vector.load %arg8[%c0_21, %c0_22] : memref<1x128xf32, #tpu.memory_space<vmem>>, vector<1x128xf32>
      %28 = vector.broadcast %27 : vector<1x128xf32> to vector<128x128xf32>
      %29 = arith.addf %26, %28 : vector<128x128xf32>
      %cst_23 = arith.constant 0.000000e+00 : f32
      %30 = vector.broadcast %cst_23 : f32 to vector<128x128xf32>
      %31 = arith.maximumf %29, %30 : vector<128x128xf32>
      %32 = tpu.iota {dimensions = array<i32: 1>} : vector<128x128xi32>
      %c16_i32 = arith.constant 16 : i32
      %33 = vector.broadcast %c16_i32 : i32 to vector<128x128xi32>
      %34 = arith.cmpi slt, %32, %33 : vector<128x128xi32>
      %35 = arith.mulf %31, %31 : vector<128x128xf32>
      %cst_24 = arith.constant dense<0.000000e+00> : vector<128xf32>
      %36 = vector.multi_reduction <add>, %35, %cst_24 [1] : vector<128x128xf32> to vector<128xf32>
      %37 = vector.shape_cast %36 : vector<128xf32> to vector<128x1xf32>
      %cst_25 = arith.constant 1.000000e+00 : f32
      %38 = vector.broadcast %cst_25 : f32 to vector<128x1xf32>
      %39 = arith.subf %37, %38 : vector<128x1xf32>
      %cst_26 = arith.constant 9.99999993E-9 : f32
      %40 = vector.broadcast %cst_26 : f32 to vector<128x1xf32>
      %41 = arith.maximumf %39, %40 : vector<128x1xf32>
      %42 = math.rsqrt %41 : vector<128x1xf32>
      %43 = vector.broadcast %42 : vector<128x1xf32> to vector<128x128xf32>
      %44 = arith.mulf %31, %43 : vector<128x128xf32>
      %cst_27 = arith.constant 0.000000e+00 : f32
      %45 = vector.broadcast %cst_27 : f32 to vector<128x128xf32>
      %46 = arith.cmpf oeq, %44, %45 : vector<128x128xf32>
      %cst_28 = arith.constant 1.000000e+00 : f32
      %cst_29 = arith.constant 0.000000e+00 : f32
      %47 = vector.broadcast %cst_28 : f32 to vector<128x128xf32>
      %48 = vector.broadcast %cst_29 : f32 to vector<128x128xf32>
      %49 = arith.select %46, %47, %48 : vector<128x128xi1>, vector<128x128xf32>
      %cst_30 = arith.constant dense<0x7F800000> : vector<128xf32>
      %50 = vector.multi_reduction <minimumf>, %49, %cst_30 [1] : vector<128x128xf32> to vector<128xf32>
      %cst_31 = arith.constant 0.000000e+00 : f32
      %51 = vector.broadcast %cst_31 : f32 to vector<128xf32>
      %52 = arith.cmpf ogt, %50, %51 : vector<128xf32>
      %53 = vector.shape_cast %52 : vector<128xi1> to vector<128x1xi1>
      %54 = vector.broadcast %53 : vector<128x1xi1> to vector<128x128xi1>
      %55 = arith.andi %54, %34 : vector<128x128xi1>
      %cst_32 = arith.constant 1.000000e+00 : f32
      %56 = vector.broadcast %cst_32 : f32 to vector<128x128xf32>
      %57 = arith.select %55, %56, %44 : vector<128x128xi1>, vector<128x128xf32>
      %58 = arith.mulf %57, %57 : vector<128x128xf32>
      %cst_33 = arith.constant dense<0.000000e+00> : vector<128xf32>
      %59 = vector.multi_reduction <add>, %58, %cst_33 [1] : vector<128x128xf32> to vector<128xf32>
      %60 = vector.shape_cast %59 : vector<128xf32> to vector<128x1xf32>
      %cst_34 = arith.constant 1.000000e-16 : f32
      %61 = vector.broadcast %cst_34 : f32 to vector<128x1xf32>
      %62 = arith.maximumf %60, %61 : vector<128x1xf32>
      %63 = math.rsqrt %62 : vector<128x1xf32>
      %64 = vector.broadcast %63 : vector<128x1xf32> to vector<128x128xf32>
      %65 = arith.mulf %57, %64 : vector<128x128xf32>
      %c16_i32_35 = arith.constant 16 : i32
      %66 = vector.broadcast %c16_i32_35 : i32 to vector<128x128xi32>
      %67 = arith.cmpi eq, %32, %66 : vector<128x128xi32>
      %cst_36 = arith.constant 1.000000e+00 : f32
      %68 = vector.broadcast %cst_36 : f32 to vector<128x128xf32>
      %69 = arith.select %67, %68, %65 : vector<128x128xi1>, vector<128x128xf32>
      %c0_37 = arith.constant 0 : index
      %c0_38 = arith.constant 0 : index
      %70 = vector.load %arg9[%c0_37, %c0_38] : memref<128x128xf32, #tpu.memory_space<vmem>>, vector<128x128xf32>
      tpu.vector_store %arg9[%c0_37, %c0_38], %69 {strides = array<i32>} : memref<128x128xf32, #tpu.memory_space<vmem>>, vector<128x128xf32>,
    } else {
    }
    return
  }
  func.func @transform_0(%arg0: i32, %arg1: i32) -> (i32, i32) {
    %c0_i32 = arith.constant 0 : i32
    return %arg0, %arg1 : i32, i32
  }
  func.func @transform_1(%arg0: i32, %arg1: i32) -> (i32, i32) {
    %c0_i32 = arith.constant 0 : i32
    %c0_i32_0 = arith.constant 0 : i32
    %c0_i32_1 = arith.constant 0 : i32
    return %c0_i32, %c0_i32_0 : i32, i32
  }
  func.func @transform_2(%arg0: i32, %arg1: i32) -> (i32, i32) {
    %c0_i32 = arith.constant 0 : i32
    %c0_i32_0 = arith.constant 0 : i32
    return %arg0, %c0_i32 : i32, i32
  }
  func.func @transform_3(%arg0: i32, %arg1: i32) -> (i32, i32) {
    %c0_i32 = arith.constant 0 : i32
    %c0_i32_0 = arith.constant 0 : i32
    return %arg0, %c0_i32 : i32, i32
  }
  func.func @transform_4(%arg0: i32, %arg1: i32) -> (i32, i32) {
    %c0_i32 = arith.constant 0 : i32
    %c0_i32_0 = arith.constant 0 : i32
    %c0_i32_1 = arith.constant 0 : i32
    return %c0_i32, %c0_i32_0 : i32, i32
  }
  func.func @transform_5(%arg0: i32, %arg1: i32) -> (i32, i32) {
    %c0_i32 = arith.constant 0 : i32
    %c0_i32_0 = arith.constant 0 : i32
    %c0_i32_1 = arith.constant 0 : i32
    return %c0_i32, %c0_i32_0 : i32, i32
  }
  func.func @transform_6(%arg0: i32, %arg1: i32) -> (i32, i32) {
    %c0_i32 = arith.constant 0 : i32
    %c0_i32_0 = arith.constant 0 : i32
    %c0_i32_1 = arith.constant 0 : i32
    return %c0_i32, %c0_i32_0 : i32, i32
  }
  func.func @transform_7(%arg0: i32, %arg1: i32) -> (i32, i32) {
    %c0_i32 = arith.constant 0 : i32
    %c0_i32_0 = arith.constant 0 : i32
    return %arg0, %c0_i32 : i32, i32
  }
}

</mosaic_0001>

<bundles_post_ra>
// kernel: tpu_custom_call.1
= control target key start
LH: loop header
LB: loop body
LE: loop exit
PB: predicated region body
PF: predicated region fallthrough
CT: control target
= control target key end

     0   :  { %12 = vsyncpa [#allocation4], 0  ;;  %s2301_s0 = inlined_call_operand.hbm [shape: s8[128,128], index: 0, kind: input, shape index: {}]   ;;  %s2302_s1 = inlined_call_operand.vmem [shape: bf16[128,128], index: 1, kind: input, shape index: {}]   ;;  %s2303_s2 = inlined_call_operand.vmem [shape: bf16[128,128], index: 2, kind: input, shape index: {}]   ;;  %s2304_s3 = inlined_call_operand.vmem [shape: f32[128,1], index: 3, kind: input, shape index: {}]   ;;  %s2305_s4 = inlined_call_operand.hbm [shape: bf16[128,128], index: 4, kind: input, shape index: {}]   ;;  %s2306_s5 = inlined_call_operand.hbm [shape: bf16[128,128], index: 5, kind: input, shape index: {}]   ;;  %s2307_s6 = inlined_call_operand.vmem [shape: f32[1,128], index: 6, kind: input, shape index: {}]   ;;  %s2308_s7 = inlined_call_operand.hbm [shape: f32[128,128], index: 7, kind: output, shape index: {}]  }
   0x1   :  { %13 = vsyncpa [#allocation7], 0 }
   0x2   :  { %14 = vsyncpa [#allocation5], 0  ;;  %s1714_s24 = smov [#allocation6]   ;;  %s1620_s28 = scalar_lea.hbm %s2305_s4, 1024 }
   0x3   :  { %s38_s25 = sshll.u32 %s1714_s24, 4  ;;  %p1621_p0 = scmp.ne.s32.totalorder %s2305_s4, %s1620_s28  ;;  %s39_s25 = int_to_ptr.vmem [resolvable:$true] %s38_s25 }
   0x4   :  { %p1624_p1 = scmp.lt.u32.totalorder %s1620_s28, %s2305_s4 }
   0x6   :  { %p1626_p2 = pnand %p1624_p1, %p1621_p0 }
   0x8   :  { %1629 = shalt.err (!%p1626_p2)
}
   0x9   :  { %s1630_s10 = scalar_lea.vmem %s39_s25, 1024  ;;  %p1635_p4 = scmp.lt.s32.totalorder %s39_s25, %s39_s25 }
   0xa   :  { %p1631_p3 = scmp.ne.s32.totalorder %s39_s25, %s1630_s10  ;;  %p1636_p5 = scmp.lt.s32.totalorder %s1630_s10, %s1630_s10 }
   0xc   :  { %p1637_p6 = por %p1636_p5, %p1635_p4 }
   0xe   :  { %p1638_p7 = pnand %p1637_p6, %p1631_p3 }
  0x10   :  { %1641 = shalt.err (!%p1638_p7)
}
  0x11   :  { %s1715_s11 = smov 64   ;;  %s1716_s12 = smov 4  }
  0x12   :  { %44 = dma.hbm_to_vmem [thread:$0]  %s2305_s4, 1024, %s39_s25, [#allocation7], %s1715_s11, %s1715_s11, %s1716_s12  }
  0x13   :  { %s1717_s15 = smov [#allocation3]   ;;  %s1642_s19 = scalar_lea.hbm %s2301_s0, 512 }
  0x14   :  { %s20_s16 = sshll.u32 %s1717_s15, 4  ;;  %p1643_p8 = scmp.ne.s32.totalorder %s2301_s0, %s1642_s19  ;;  %s21_s16 = int_to_ptr.vmem [resolvable:$true] %s20_s16 }
  0x15   :  { %p1646_p9 = scmp.lt.u32.totalorder %s1642_s19, %s2301_s0 }
  0x17   :  { %p1648_p10 = pnand %p1646_p9, %p1643_p8 }
  0x19   :  { %1651 = shalt.err (!%p1648_p10)
}
  0x1a   :  { %s1652_s24 = scalar_lea.vmem %s21_s16, 512  ;;  %p1657_p12 = scmp.lt.s32.totalorder %s21_s16, %s21_s16 }
  0x1b   :  { %p1653_p11 = scmp.ne.s32.totalorder %s21_s16, %s1652_s24  ;;  %p1658_p13 = scmp.lt.s32.totalorder %s1652_s24, %s1652_s24 }
  0x1d   :  { %p1659_p0 = por %p1658_p13, %p1657_p12 }
  0x1f   :  { %p1660_p1 = pnand %p1659_p0, %p1653_p11 }
  0x21   :  { %1663 = shalt.err (!%p1660_p1)
}
  0x22   :  { %s1718_s4 = smov 128   ;;  %s1719_s25 = smov 8  }
  0x23   :  { %26 = dma.hbm_to_vmem [thread:$0]  %s2301_s0, 512, %s21_s16, [#allocation4], %s1718_s4, %s1718_s4, %s1719_s25  }
  0x24   :  { %s1720_s28 = smov [#allocation8]   ;;  %s1664_s9 = scalar_lea.hbm %s2306_s5, 1024 }
  0x25   :  { %s50_s29 = sshll.u32 %s1720_s28, 4  ;;  %p1665_p2 = scmp.ne.s32.totalorder %s2306_s5, %s1664_s9  ;;  %s51_s29 = int_to_ptr.vmem [resolvable:$true] %s50_s29 }
  0x26   :  { %p1668_p3 = scmp.lt.u32.totalorder %s1664_s9, %s2306_s5 }
  0x28   :  { %p1670_p4 = pnand %p1668_p3, %p1665_p2 }
  0x2a   :  { %1673 = shalt.err (!%p1670_p4)
}
  0x2b   :  { %s1674_s17 = scalar_lea.vmem %s51_s29, 1024  ;;  %p1679_p6 = scmp.lt.s32.totalorder %s51_s29, %s51_s29 }
  0x2c   :  { %p1675_p5 = scmp.ne.s32.totalorder %s51_s29, %s1674_s17  ;;  %p1680_p7 = scmp.lt.s32.totalorder %s1674_s17, %s1674_s17 }
  0x2e   :  { %p1681_p8 = por %p1680_p7, %p1679_p6 }
  0x30   :  { %p1682_p9 = pnand %p1681_p8, %p1675_p5 }
  0x32   :  { %1685 = shalt.err (!%p1682_p9)
}
  0x33   :  { %56 = dma.hbm_to_vmem [thread:$0]  %s2306_s5, 1024, %s51_s29, [#allocation7], %s1715_s11, %s1715_s11, %s1716_s12  }
  0x34   :  { %1708 = dma.done.wait [#allocation4], 512  }
  0x35   :  { %1709 = vsyncadd [#allocation4], 4294966784 }
  0x36   :  { %1710 = dma.done.wait [#allocation7], 2048  }
  0x37   :  { %1711 = vsyncadd [#allocation7], 4294965248  ;;  %v1721_v0 = vmov 0   ;;  %v1524_v1 = vld [vmem:[%s2302_s1] sm:$0xff]   ;;  %v1525_v2 = vld [vmem:[%s2302_s1 + $0x8] sm:$0xff]  }
  0x38   :  { %1522 = vset.pattern.permute.xlu0 %v1721_v0  ;;  %1523 = vset.pattern.permute.xlu1 %v1721_v0  ;;  %v1526_v3 = vld [vmem:[%s2302_s1 + $0x10] sm:$0xff]   ;;  %v1527_v4 = vld [vmem:[%s2302_s1 + $0x18] sm:$0xff]   ;;  %v1821_v5 = vld [vmem:[#allocation3] sm:$0xff] }
  0x39   :  { %1384 = vmatprep.subr.bf16.mxu0 %v1524_v1  ;;  %v93_v6 = vunpack.c.l.s8.bf16 %v1821_v5  ;;  %v334_v7 = vld [vmem:[%s2304_s3] sm:$0xff]  ;;  %v336_v8 = vld [vmem:[%s2304_s3 + $0x10] sm:$0xff]  ;;  %v335_v9 = vld [vmem:[%s2304_s3 + $0x8] sm:$0xff]  ;;  %v94_v31 = vunpack.c.h.s8.bf16 %v1821_v5 }
  0x3a   :  { %1385 = vmatpush3.bf16.msra.mxu0 %v1524_v1  ;;  %352 = vperm.xlu0 %1522, %v334_v7   ;;  %v337_v10 = vld [vmem:[%s2304_s3 + $0x18] sm:$0xff]  ;;  %v1528_v11 = vld [vmem:[%s2302_s1 + $0x20] sm:$0xff]   ;;  %v339_v13 = vld [vmem:[%s2304_s3 + $0x28] sm:$0xff] }
  0x3b   :  { %1386 = vmatprep.subr.bf16.mxu0 %v1525_v2  ;;  %362 = vperm.xlu1 %1523, %v336_v8   ;;  %v338_v12 = vld [vmem:[%s2304_s3 + $0x20] sm:$0xff]  ;;  %v1529_v15 = vld [vmem:[%s2302_s1 + $0x28] sm:$0xff]   ;;  %v340_v16 = vld [vmem:[%s2304_s3 + $0x30] sm:$0xff] }
  0x3c   :  { %1400 = vmatprep.mubr.bf16.mxu0 %v93_v6  ;;  %v1532_v14 = vld [vmem:[#allocation8] sm:$0xff]   ;;  %v1534_v17 = vld [vmem:[#allocation8 + $0x8] sm:$0xff]   ;;  %v1530_v18 = vld [vmem:[%s2302_s1 + $0x30] sm:$0xff]  }
  0x3d   :  { %1416 = vmatprep.subr.bf16.mxu1 %v1532_v14  ;;  %v341_v19 = vld [vmem:[%s2304_s3 + $0x38] sm:$0xff]  ;;  %v342_v20 = vld [vmem:[%s2304_s3 + $0x40] sm:$0xff]  ;;  %v343_v21 = vld [vmem:[%s2304_s3 + $0x48] sm:$0xff] }
  0x3e   :  { %1387 = vmatpush3.bf16.msra.mxu0 %v1525_v2  ;;  %357 = vperm.xlu0 %1522, %v335_v9   ;;  %v1536_v22 = vld [vmem:[#allocation8 + $0x10] sm:$0xff]   ;;  %v1531_v23 = vld [vmem:[%s2302_s1 + $0x38] sm:$0xff]   ;;  %v90_v27 = vld [vmem:[#allocation3 + $0x8] sm:$0xff] }
  0x3f   :  { %1388 = vmatprep.subr.bf16.mxu0 %v1526_v3  ;;  %367 = vperm.xlu1 %1523, %v337_v10   ;;  %v344_v24 = vld [vmem:[%s2304_s3 + $0x50] sm:$0xff]  ;;  %v345_v25 = vld [vmem:[%s2304_s3 + $0x58] sm:$0xff]  ;;  %v1872_v28 = vld [vmem:[#allocation6] sm:$0xff]   ;;  %v95_v33 = vunpack.c.l.s8.bf16 %v90_v27  ;;  %v96_v41 = vunpack.c.h.s8.bf16 %v90_v27 }
  0x40   :  { %1417 = vmatpush3.bf16.msra.mxu1 %v1532_v14  ;;  %v1538_v26 = vld [vmem:[#allocation8 + $0x18] sm:$0xff]   ;;  %v346_v29 = vld [vmem:[%s2304_s3 + $0x60] sm:$0xff]  ;;  %v347_v32 = vld [vmem:[%s2304_s3 + $0x68] sm:$0xff] }
  0x41   :  { %1418 = vmatprep.subr.bf16.mxu1 %v1534_v17  ;;  %v1540_v30 = vld [vmem:[#allocation8 + $0x20] sm:$0xff]   ;;  %v1881_v34 = vld [vmem:[#allocation6 + $0x8] sm:$0xff]   ;;  %v348_v36 = vld [vmem:[%s2304_s3 + $0x70] sm:$0xff] }
  0x42   :  { %1389 = vmatpush3.bf16.msra.mxu0 %v1526_v3  ;;  %372 = vperm.xlu0 %1522, %v338_v12   ;;  %v1542_v35 = vld [vmem:[#allocation8 + $0x28] sm:$0xff]   ;;  %v91_v37 = vld [vmem:[#allocation3 + $0x10] sm:$0xff]  ;;  %v349_v38 = vld [vmem:[%s2304_s3 + $0x78] sm:$0xff] }
  0x43   :  { %1390 = vmatprep.subr.bf16.mxu0 %v1527_v4  ;;  %377 = vperm.xlu1 %1523, %v339_v13   ;;  %v1892_v39 = vld [vmem:[#allocation6 + $0x10] sm:$0xff]   ;;  %v97_v42 = vunpack.c.l.s8.bf16 %v91_v37  ;;  %v1896_v43 = vld [vmem:[#allocation6 + $0x18] sm:$0xff]   ;;  %v1900_v45 = vld [vmem:[#allocation6 + $0x20] sm:$0xff]   ;;  %v98_v46 = vunpack.c.h.s8.bf16 %v91_v37 }
  0x44   :  { %1419 = vmatpush3.bf16.msra.mxu1 %v1534_v17  ;;  %v1544_v40 = vld [vmem:[#allocation8 + $0x30] sm:$0xff]   ;;  %v92_v44 = vld [vmem:[#allocation3 + $0x18] sm:$0xff]  ;;  %v1904_v48 = vld [vmem:[#allocation6 + $0x28] sm:$0xff]  }
  0x45   :  { %1420 = vmatprep.subr.bf16.mxu1 %v1536_v22  ;;  %v99_v47 = vunpack.c.l.s8.bf16 %v92_v44  ;;  %v100_v49 = vunpack.c.h.s8.bf16 %v92_v44  ;;  %v1909_v50 = vld [vmem:[#allocation6 + $0x30] sm:$0xff]   ;;  %v1546_v51 = vld [vmem:[#allocation8 + $0x38] sm:$0xff]   ;;  %v1548_v53 = vld [vmem:[%s2303_s2] sm:$0xff]  }
  0x46   :  { %1391 = vmatpush3.bf16.msra.mxu0 %v1527_v4  ;;  %382 = vperm.xlu0 %1522, %v340_v16   ;;  %v1913_v52 = vld [vmem:[#allocation6 + $0x38] sm:$0xff]   ;;  %v1549_v54 = vld [vmem:[%s2303_s2 + $0x8] sm:$0xff]   ;;  %v1550_v55 = vld [vmem:[%s2303_s2 + $0x10] sm:$0xff]  }
  0x47   :  { %1392 = vmatprep.subr.bf16.mxu0 %v1528_v11  ;;  %387 = vperm.xlu1 %1523, %v341_v19   ;;  %v1551_v56 = vld [vmem:[%s2303_s2 + $0x18] sm:$0xff]  }
  0x48   :  { %1421 = vmatpush3.bf16.msra.mxu1 %v1536_v22 }
  0x49   :  { %1422 = vmatprep.subr.bf16.mxu1 %v1538_v26 }
  0x4a   :  { %1393 = vmatpush3.bf16.msra.mxu0 %v1528_v11  ;;  %392 = vperm.xlu0 %1522, %v342_v20  }
  0x4b   :  { %1394 = vmatprep.subr.bf16.mxu0 %v1529_v15  ;;  %397 = vperm.xlu1 %1523, %v343_v21  }
  0x4c   :  { %1423 = vmatpush3.bf16.msra.mxu1 %v1538_v26 }
  0x4d   :  { %1424 = vmatprep.subr.bf16.mxu1 %v1540_v30 }
  0x4e   :  { %1395 = vmatpush3.bf16.msra.mxu0 %v1529_v15  ;;  %402 = vperm.xlu0 %1522, %v344_v24  }
  0x4f   :  { %1396 = vmatprep.subr.bf16.mxu0 %v1530_v18  ;;  %407 = vperm.xlu1 %1523, %v345_v25  }
  0x50   :  { %1425 = vmatpush3.bf16.msra.mxu1 %v1540_v30 }
  0x51   :  { %1426 = vmatprep.subr.bf16.mxu1 %v1542_v35 }
  0x52   :  { %1397 = vmatpush3.bf16.msra.mxu0 %v1530_v18  ;;  %412 = vperm.xlu0 %1522, %v346_v29  }
  0x53   :  { %1398 = vmatprep.subr.bf16.mxu0 %v1531_v23  ;;  %417 = vperm.xlu1 %1523, %v347_v32  }
  0x54   :  { %1427 = vmatpush3.bf16.msra.mxu1 %v1542_v35 }
  0x55   :  { %1428 = vmatprep.subr.bf16.mxu1 %v1544_v40 }
  0x56   :  { %1399 = vmatpush3.bf16.msra.mxu0 %v1531_v23  ;;  %422 = vperm.xlu0 %1522, %v348_v36  }
  0x57   :  { %1448 = vmatprep.subr.bf16.mxu0 %v1872_v28  ;;  %427 = vperm.xlu1 %1523, %v349_v38  }
  0x58   :  { %1429 = vmatpush3.bf16.msra.mxu1 %v1544_v40 }
  0x59   :  { %1401 = vmatmul.mubr.bf16.vlgmr.msra.gmra.mrb[0].mxu0 %v94_v31  ;;  %1430 = vmatprep.subr.bf16.mxu1 %v1546_v51 }
  0x5a   :  { %1404 = vmatprep.mubr.bf16.mxu0 %v95_v33  ;;  %1449 = vmatpush3.bf16.msra.mxu0 %v1872_v28 }
  0x5b   :  { %1450 = vmatprep.subr.bf16.mxu0 %v1881_v34 }
  0x5c   :  { %1431 = vmatpush3.bf16.msra.mxu1 %v1546_v51 }
  0x5d   :  { %1480 = vmatprep.subr.bf16.mxu1 %v1872_v28 }
  0x5e   :  { %1451 = vmatpush3.bf16.msra.mxu0 %v1881_v34 }
  0x5f   :  { %1452 = vmatprep.subr.bf16.mxu0 %v1892_v39 }
  0x61   :  { %1405 = vmatmul.mubr.bf16.gmra.mrb[4].mxu0 %v96_v41 }
  0x62   :  { %1408 = vmatprep.mubr.bf16.mxu0 %v97_v42  ;;  %1453 = vmatpush3.bf16.msra.mxu0 %v1892_v39 }
  0x63   :  { %1454 = vmatprep.subr.bf16.mxu0 %v1896_v43 }
  0x66   :  { %1455 = vmatpush3.bf16.msra.mxu0 %v1896_v43 }
  0x67   :  { %1456 = vmatprep.subr.bf16.mxu0 %v1900_v45 }
  0x69   :  { %1409 = vmatmul.mubr.bf16.gmra.mrb[8].mxu0 %v98_v46 }
  0x6a   :  { %1412 = vmatprep.mubr.bf16.mxu0 %v99_v47  ;;  %1457 = vmatpush3.bf16.msra.mxu0 %v1900_v45 }
  0x6b   :  { %1458 = vmatprep.subr.bf16.mxu0 %v1904_v48 }
  0x6e   :  { %1459 = vmatpush3.bf16.msra.mxu0 %v1904_v48 }
  0x6f   :  { %1460 = vmatprep.subr.bf16.mxu0 %v1909_v50 }
  0x71   :  { %1413 = vmatmul.mubr.bf16.gmra.mrb[12].mxu0 %v100_v49 }
  0x72   :  { %1461 = vmatpush3.bf16.msra.mxu0 %v1909_v50  ;;  %1464 = vmatprep.mubr.bf16.mxu0 %v1548_v53  ;;  %v1552_v53 = vld [vmem:[%s2303_s2 + $0x20] sm:$0xff]  }
  0x73   :  { %1462 = vmatprep.subr.bf16.mxu0 %v1913_v52 }
  0x76   :  { %1463 = vmatpush3.bf16.msra.mxu0 %v1913_v52 }
  0x79   :  { %1465 = vmatmul.mubr.bf16.vlgmr.msra.gmra.mrb[16].mxu0 %v1549_v54  ;;  %v1555_v54 = vld [vmem:[%s2303_s2 + $0x38] sm:$0xff]  }
  0x7a   :  { %1468 = vmatprep.mubr.bf16.mxu0 %v1550_v55 }
  0x81   :  { %1469 = vmatmul.mubr.bf16.gmra.mrb[20].mxu0 %v1551_v56 }
  0xb9   :  { %v353_v57 = vpop.permute.xlu0 %352 }
  0xba   :  { %v363_v58 = vpop.permute.xlu1 %362 }
  0xbd   :  { %v358_v59 = vpop.permute.xlu0 %357 }
  0xbe   :  { %v368_v60 = vpop.permute.xlu1 %367 }
  0xc1   :  { %v373_v61 = vpop.permute.xlu0 %372 }
  0xc2   :  { %v378_v62 = vpop.permute.xlu1 %377 }
  0xc5   :  { %v383_v0 = vpop.permute.xlu0 %382 }
  0xc6   :  { %v388_v2 = vpop.permute.xlu1 %387 }
  0xc9   :  { %v393_v11 = vpop.permute.xlu0 %392 }
  0xca   :  { %v398_v12 = vpop.permute.xlu1 %397 }
  0xcd   :  { %v403_v21 = vpop.permute.xlu0 %402 }
  0xce   :  { %v408_v23 = vpop.permute.xlu1 %407 }
  0xd2   :  { %v418_v32 = vpop.permute.xlu1 %417 }
  0xd6   :  { %v428_v40 = vpop.permute.xlu1 %427 }
 0x12c   :  { %v1402_v63 = vpop.f32.mrb[0].mxu0 }
 0x12d   :  { %v220_v1 = vpop.f32.mrb[1].mxu0  ;;  %v432_v4 = vmul.f32 %v1402_v63, %v363_v58 }
 0x12e   :  { %v1403_v3 = vpop.f32.mrb[2].mxu0  ;;  %v430_v7 = vmul.f32 %v353_v57, %v220_v1 }
 0x12f   :  { %v433_v5 = vmul.f32 %v1403_v3, %v368_v60  ;;  %v223_v6 = vpop.f32.mrb[3].mxu0 }
 0x130   :  { %v431_v8 = vmul.f32 %v358_v59, %v223_v6 }
 0x131   :  { %v479_v9 = vpack.c.bf16 %v433_v5, %v432_v4 }
 0x132   :  { %v478_v10 = vpack.c.bf16 %v431_v8, %v430_v7 }
 0x134   :  { %v1406_v13 = vpop.f32.mrb[4].mxu0  ;;  %1432 = vmatprep.mubr.bf16.mxu1 %v478_v10 }
 0x135   :  { %v236_v14 = vpop.f32.mrb[5].mxu0  ;;  %1433 = vmatmul.mubr.bf16.vlgmr.msra.gmra.mrb[0].mxu1 %v479_v9  ;;  %v436_v16 = vmul.f32 %v1406_v13, %v383_v0 }
 0x136   :  { %1488 = vmatpush3.bf16.msra.mxu1 %v1872_v28  ;;  %v1407_v15 = vpop.f32.mrb[6].mxu0  ;;  %v434_v19 = vmul.f32 %v373_v61, %v236_v14  ;;  %v413_v28 = vpop.permute.xlu0 %412 }
 0x137   :  { %v437_v17 = vmul.f32 %v1407_v15, %v388_v2  ;;  %v239_v18 = vpop.f32.mrb[7].mxu0  ;;  %1481 = vmatprep.subr.bf16.mxu1 %v1881_v34 }
 0x138   :  { %v435_v20 = vmul.f32 %v378_v62, %v239_v18  ;;  %v1960_v62 = vld [vmem:[%s2307_s6] ss:$0 sm:$0xff] }
 0x139   :  { %v481_v22 = vpack.c.bf16 %v437_v17, %v436_v16 }
 0x13a   :  { %v480_v24 = vpack.c.bf16 %v435_v20, %v434_v19  ;;  %1489 = vmatpush3.bf16.msra.mxu1 %v1881_v34  ;;  %v423_v38 = vpop.permute.xlu0 %422 }
 0x13b   :  { %1482 = vmatprep.subr.bf16.mxu1 %v1892_v39 }
 0x13c   :  { %v1410_v25 = vpop.f32.mrb[8].mxu0  ;;  %1436 = vmatprep.mubr.bf16.mxu1 %v480_v24 }
 0x13d   :  { %v252_v26 = vpop.f32.mrb[9].mxu0  ;;  %1437 = vmatmul.mubr.bf16.gmra.mrb[4].mxu1 %v481_v22  ;;  %v440_v29 = vmul.f32 %v1410_v25, %v403_v21 }
 0x13e   :  { %1490 = vmatpush3.bf16.msra.mxu1 %v1892_v39  ;;  %v1411_v27 = vpop.f32.mrb[10].mxu0  ;;  %v438_v33 = vmul.f32 %v393_v11, %v252_v26 }
 0x13f   :  { %v441_v30 = vmul.f32 %v1411_v27, %v408_v23  ;;  %v255_v31 = vpop.f32.mrb[11].mxu0  ;;  %1483 = vmatprep.subr.bf16.mxu1 %v1896_v43 }
 0x140   :  { %v439_v35 = vmul.f32 %v398_v12, %v255_v31 }
 0x141   :  { %v483_v36 = vpack.c.bf16 %v441_v30, %v440_v29 }
 0x142   :  { %v482_v34 = vpack.c.bf16 %v439_v35, %v438_v33  ;;  %1491 = vmatpush3.bf16.msra.mxu1 %v1896_v43 }
 0x143   :  { %1484 = vmatprep.subr.bf16.mxu1 %v1900_v45 }
 0x144   :  { %v1414_v37 = vpop.f32.mrb[12].mxu0  ;;  %1440 = vmatprep.mubr.bf16.mxu1 %v482_v34 }
 0x145   :  { %v268_v39 = vpop.f32.mrb[13].mxu0  ;;  %1441 = vmatmul.mubr.bf16.gmra.mrb[8].mxu1 %v483_v36  ;;  %v444_v42 = vmul.f32 %v1414_v37, %v423_v38 }
 0x146   :  { %1492 = vmatpush3.bf16.msra.mxu1 %v1900_v45  ;;  %v1415_v41 = vpop.f32.mrb[14].mxu0  ;;  %v442_v47 = vmul.f32 %v413_v28, %v268_v39  ;;  %v1553_v45 = vld [vmem:[%s2303_s2 + $0x28] sm:$0xff]  }
 0x147   :  { %v445_v44 = vmul.f32 %v1415_v41, %v428_v40  ;;  %v271_v46 = vpop.f32.mrb[15].mxu0  ;;  %1485 = vmatprep.subr.bf16.mxu1 %v1904_v48 }
 0x148   :  { %v443_v49 = vmul.f32 %v418_v32, %v271_v46 }
 0x149   :  { %v485_v51 = vpack.c.bf16 %v445_v44, %v444_v42 }
 0x14a   :  { %v484_v43 = vpack.c.bf16 %v443_v49, %v442_v47  ;;  %1493 = vmatpush3.bf16.msra.mxu1 %v1904_v48  ;;  %v1554_v48 = vld [vmem:[%s2303_s2 + $0x30] sm:$0xff]   ;;  %s1723_s2 = smov [#allocation9]  }
 0x14b   :  { %1486 = vmatprep.subr.bf16.mxu1 %v1909_v50  ;;  %s1272_s6 = sshll.u32 %s1723_s2, 4  ;;  %s1273_s6 = int_to_ptr.vmem [resolvable:$true] %s1272_s6 }
 0x14c   :  { %1444 = vmatprep.mubr.bf16.mxu1 %v484_v43  ;;  %s1686_s1 = scalar_lea.vmem %s1273_s6, 2048  ;;  %p1691_p11 = scmp.lt.s32.totalorder %s1273_s6, %s1273_s6 }
 0x14d   :  { %1445 = vmatmul.mubr.bf16.gmra.mrb[12].mxu1 %v485_v51  ;;  %p1687_p10 = scmp.ne.s32.totalorder %s1273_s6, %s1686_s1  ;;  %p1692_p12 = scmp.lt.s32.totalorder %s1686_s1, %s1686_s1 }
 0x14e   :  { %1494 = vmatpush3.bf16.msra.mxu1 %v1909_v50  ;;  %1472 = vmatprep.mubr.bf16.mxu1 %v1552_v53  ;;  %v1466_v50 = vpop.f32.mrb[16].mxu0 }
 0x14f   :  { %1487 = vmatprep.subr.bf16.mxu1 %v1913_v52  ;;  %v777_v55 = vpop.f32.mrb[17].mxu0  ;;  %p1693_p13 = por %p1692_p12, %p1691_p11 }
 0x150   :  { %v1467_v56 = vpop.f32.mrb[18].mxu0 }
 0x151   :  { %v780_v57 = vpop.f32.mrb[19].mxu0  ;;  %p1694_p0 = pnand %p1693_p13, %p1687_p10 }
 0x152   :  { %1495 = vmatpush3.bf16.msra.mxu1 %v1913_v52 }
 0x154   :  { %v1470_v58 = vpop.f32.mrb[20].mxu0 }
 0x155   :  { %1473 = vmatmul.mubr.bf16.vlgmr.msra.gmra.mrb[8].mxu1 %v1553_v45  ;;  %v793_v59 = vpop.f32.mrb[21].mxu0 }
 0x156   :  { %1476 = vmatprep.mubr.bf16.mxu1 %v1554_v48  ;;  %v1471_v60 = vpop.f32.mrb[22].mxu0 }
 0x157   :  { %v796_v61 = vpop.f32.mrb[23].mxu0 }
 0x15d   :  { %1477 = vmatmul.mubr.bf16.gmra.mrb[12].mxu1 %v1555_v54 }
 0x208   :  { %v1434_v52 = vpop.f32.mrb[0].mxu1 }
 0x209   :  { %v786_v63 = vadd.f32 %v1466_v50, %v1434_v52  ;;  %v584_v0 = vpop.f32.mrb[1].mxu1 }
 0x20a   :  { %v778_v1 = vadd.f32 %v777_v55, %v584_v0  ;;  %v1435_v2 = vpop.f32.mrb[2].mxu1 }
 0x20b   :  { %v849_v3 = vadd.f32 %v1960_v62, %v786_v63  ;;  %v789_v4 = vadd.f32 %v1467_v56, %v1435_v2  ;;  %v587_v5 = vpop.f32.mrb[3].mxu1 }
 0x20c   :  { %v847_v6 = vadd.f32 %v1960_v62, %v778_v1  ;;  %v781_v7 = vadd.f32 %v780_v57, %v587_v5 }
 0x20d   :  { %v1964_v8 = vmax.f32 %v849_v3, 0.0  ;;  %v850_v9 = vadd.f32 %v1960_v62, %v789_v4 }
 0x20e   :  { %v848_v10 = vadd.f32 %v1960_v62, %v781_v7  ;;  %v1968_v11 = vmax.f32 %v847_v6, 0.0 }
 0x20f   :  { %v884_v12 = vmul.f32 %v1964_v8, %v1964_v8  ;;  %v1974_v17 = vmax.f32 %v850_v9, 0.0 }
 0x210   :  { %v1972_v13 = vmax.f32 %v848_v10, 0.0  ;;  %v1438_v14 = vpop.f32.mrb[4].mxu1  ;;  %v882_v24 = vmul.f32 %v1968_v11, %v1968_v11 }
 0x211   :  { %v802_v15 = vadd.f32 %v1470_v58, %v1438_v14  ;;  %v600_v16 = vpop.f32.mrb[5].mxu1  ;;  %902 = vadd.xlane.f32.xlu0 %v884_v12  ;;  %v885_v29 = vmul.f32 %v1974_v17, %v1974_v17 }
 0x212   :  { %v794_v18 = vadd.f32 %v793_v59, %v600_v16  ;;  %v1439_v19 = vpop.f32.mrb[6].mxu1  ;;  %v883_v20 = vmul.f32 %v1972_v13, %v1972_v13 }
 0x213   :  { %v853_v21 = vadd.f32 %v1960_v62, %v802_v15  ;;  %v805_v22 = vadd.f32 %v1471_v60, %v1439_v19  ;;  %v603_v23 = vpop.f32.mrb[7].mxu1 }
 0x214   :  { %v851_v25 = vadd.f32 %v1960_v62, %v794_v18  ;;  %v797_v26 = vadd.f32 %v796_v61, %v603_v23  ;;  %900 = vadd.xlane.f32.xlu1 %v883_v20 }
 0x215   :  { %v1982_v27 = vmax.f32 %v853_v21, 0.0  ;;  %v854_v28 = vadd.f32 %v1960_v62, %v805_v22  ;;  %898 = vadd.xlane.f32.xlu0 %v882_v24 }
 0x216   :  { %v1987_v30 = vmax.f32 %v851_v25, 0.0  ;;  %v852_v32 = vadd.f32 %v1960_v62, %v797_v26 }
 0x217   :  { %v1989_v31 = vmax.f32 %v854_v28, 0.0  ;;  %v888_v33 = vmul.f32 %v1982_v27, %v1982_v27 }
 0x218   :  { %v1994_v35 = vmax.f32 %v852_v32, 0.0  ;;  %v886_v36 = vmul.f32 %v1987_v30, %v1987_v30 }
 0x219   :  { %910 = vadd.xlane.f32.xlu1 %v888_v33  ;;  %904 = vadd.xlane.f32.xlu0 %v885_v29  ;;  %v889_v34 = vmul.f32 %v1989_v31, %v1989_v31 }
 0x21a   :  { %v887_v37 = vmul.f32 %v1994_v35, %v1994_v35 }
 0x21d   :  { %906 = vadd.xlane.f32.xlu1 %v886_v36  ;;  %912 = vadd.xlane.f32.xlu0 %v889_v34 }
 0x221   :  { %908 = vadd.xlane.f32.xlu0 %v887_v37 }
 0x228   :  { %v1474_v38 = vpop.f32.mrb[8].mxu1 }
 0x229   :  { %v857_v39 = vadd.f32 %v1474_v38, %v1960_v62  ;;  %v809_v40 = vpop.f32.mrb[9].mxu1 }
 0x22a   :  { %v855_v41 = vadd.f32 %v1960_v62, %v809_v40  ;;  %v1475_v42 = vpop.f32.mrb[10].mxu1 }
 0x22b   :  { %v2004_v44 = vmax.f32 %v857_v39, 0.0  ;;  %v858_v46 = vadd.f32 %v1475_v42, %v1960_v62  ;;  %v812_v47 = vpop.f32.mrb[11].mxu1 }
 0x22c   :  { %v856_v49 = vadd.f32 %v1960_v62, %v812_v47  ;;  %v2008_v51 = vmax.f32 %v855_v41, 0.0  ;;  %v1722_v41 = vmov 0.0  }
 0x22d   :  { %v2010_v43 = vmax.f32 %v858_v46, 0.0  ;;  %v892_v53 = vmul.f32 %v2004_v44, %v2004_v44 }
 0x22e   :  { %v2014_v45 = vmax.f32 %v856_v49, 0.0  ;;  %v890_v55 = vmul.f32 %v2008_v51, %v2008_v51 }
 0x22f   :  { %918 = vadd.xlane.f32.xlu1 %v892_v53  ;;  %v893_v48 = vmul.f32 %v2010_v43, %v2010_v43 }
 0x230   :  { %v1478_v54 = vpop.f32.mrb[12].mxu1  ;;  %v891_v60 = vmul.f32 %v2014_v45, %v2014_v45 }
 0x231   :  { %920 = vadd.xlane.f32.xlu0 %v893_v48  ;;  %v825_v50 = vpop.f32.mrb[13].mxu1  ;;  %v861_v56 = vadd.f32 %v1478_v54, %v1960_v62 }
 0x232   :  { %v859_v57 = vadd.f32 %v1960_v62, %v825_v50  ;;  %v1479_v58 = vpop.f32.mrb[14].mxu1 }
 0x233   :  { %914 = vadd.xlane.f32.xlu1 %v890_v55  ;;  %v828_v59 = vpop.f32.mrb[15].mxu1  ;;  %v862_v52 = vadd.f32 %v1479_v58, %v1960_v62  ;;  %v2028_v0 = vmax.f32 %v861_v56, 0.0 }
 0x234   :  { %v2024_v61 = vmax.f32 %v859_v57, 0.0  ;;  %v860_v63 = vadd.f32 %v1960_v62, %v828_v59 }
 0x235   :  { %916 = vadd.xlane.f32.xlu0 %v891_v60  ;;  %v2034_v3 = vmax.f32 %v862_v52, 0.0  ;;  %v896_v5 = vmul.f32 %v2028_v0, %v2028_v0 }
 0x236   :  { %v2030_v1 = vmax.f32 %v860_v63, 0.0  ;;  %v894_v2 = vmul.f32 %v2024_v61, %v2024_v61 }
 0x237   :  { %v897_v62 = vmul.f32 %v2034_v3, %v2034_v3 }
 0x238   :  { %922 = vadd.xlane.f32.xlu1 %v894_v2  ;;  %v895_v4 = vmul.f32 %v2030_v1, %v2030_v1 }
 0x23a   :  { %924 = vadd.xlane.f32.xlu0 %v895_v4 }
 0x23c   :  { %926 = vadd.xlane.f32.xlu1 %v896_v5 }
 0x23e   :  { %928 = vadd.xlane.f32.xlu0 %v897_v62 }
 0x29e   :  { %v903_v6 = vpop.xlane.xlu0 %902 }
 0x29f   :  { %v1322_v7 = vadd.f32 -1.0, %v903_v6 }
 0x2a1   :  { %v948_v9 = vmax.f32 %v1322_v7, 1e-08  ;;  %v901_v10 = vpop.xlane.xlu1 %900 }
 0x2a2   :  { %v1321_v12 = vadd.f32 -1.0, %v901_v10  ;;  %v899_v14 = vpop.xlane.xlu0 %898 }
 0x2a3   :  { %1556 = vrsqrt.f32 %v948_v9  ;;  %v1320_v15 = vadd.f32 -1.0, %v899_v14 }
 0x2a4   :  { %v947_v18 = vmax.f32 %v1321_v12, 1e-08 }
 0x2a5   :  { %v946_v16 = vmax.f32 %v1320_v15, 1e-08 }
 0x2a6   :  { %v911_v19 = vpop.xlane.xlu1 %910  ;;  %v905_v20 = vpop.xlane.xlu0 %904 }
 0x2a7   :  { %1558 = vrsqrt.f32 %v946_v16  ;;  %v1326_v21 = vadd.f32 -1.0, %v911_v19  ;;  %v1323_v22 = vadd.f32 -1.0, %v905_v20 }
 0x2a8   :  { %1560 = vrsqrt.f32 %v947_v18 }
 0x2a9   :  { %v952_v23 = vmax.f32 %v1326_v21, 1e-08  ;;  %v949_v24 = vmax.f32 %v1323_v22, 1e-08 }
 0x2aa   :  { %v907_v25 = vpop.xlane.xlu1 %906  ;;  %v913_v26 = vpop.xlane.xlu0 %912 }
 0x2ab   :  { %1562 = vrsqrt.f32 %v952_v23  ;;  %v1324_v28 = vadd.f32 -1.0, %v907_v25  ;;  %v1327_v29 = vadd.f32 -1.0, %v913_v26 }
 0x2ac   :  { %1564 = vrsqrt.f32 %v949_v24 }
 0x2ad   :  { %v1557_v32 = vpop.eup %1556  ;;  %v950_v33 = vmax.f32 %v1324_v28, 1e-08  ;;  %v953_v36 = vmax.f32 %v1327_v29, 1e-08 }
 0x2ae   :  { %v909_v34 = vpop.xlane.xlu0 %908  ;;  %v2043_v37 = vmul.f32 %v1557_v32, %v1964_v8 }
 0x2af   :  { %1566 = vrsqrt.f32 %v950_v33  ;;  %v1325_v38 = vadd.f32 -1.0, %v909_v34 }
 0x2b0   :  { %1568 = vrsqrt.f32 %v953_v36  ;;  %vm996_vm0 = vcmp.eq.f32.partialorder %v2043_v37, 0.0 }
 0x2b1   :  { %v1559_v39 = vpop.eup %1558  ;;  %v951_v40 = vmax.f32 %v1325_v38, 1e-08  ;;  %v1012_v42 = vsel %vm996_vm0, 1.0, %v1722_v41 }
 0x2b2   :  { %1030 = vmin.xlane.f32.xlu1 %v1012_v42  ;;  %v2048_v46 = vmul.f32 %v1559_v39, %v1968_v11  ;;  %v1561_v47 = vpop.eup %1560 }
 0x2b3   :  { %1570 = vrsqrt.f32 %v951_v40  ;;  %v2059_v50 = vmul.f32 %v1561_v47, %v1972_v13 }
 0x2b4   :  { %vm994_vm1 = vcmp.eq.f32.partialorder %v2048_v46, 0.0 }
 0x2b5   :  { %v1563_v8 = vpop.eup %1562  ;;  %v1010_v49 = vsel %vm994_vm1, 1.0, %v1722_v41  ;;  %vm995_vm4 = vcmp.eq.f32.partialorder %v2059_v50, 0.0 }
 0x2b6   :  { %v1565_v53 = vpop.eup %1564  ;;  %1026 = vmin.xlane.f32.xlu1 %v1010_v49  ;;  %v2053_v48 = vmul.f32 %v1563_v8, %v1982_v27  ;;  %v1011_v63 = vsel %vm995_vm4, 1.0, %v1722_v41 }
 0x2b7   :  { %v2056_v54 = vmul.f32 %v1565_v53, %v1974_v17 }
 0x2b8   :  { %vm1000_vm2 = vcmp.eq.f32.partialorder %v2053_v48, 0.0 }
 0x2b9   :  { %v1567_v11 = vpop.eup %1566  ;;  %v1016_v55 = vsel %vm1000_vm2, 1.0, %v1722_v41  ;;  %vm997_vm3 = vcmp.eq.f32.partialorder %v2056_v54, 0.0 }
 0x2ba   :  { %v1569_v56 = vpop.eup %1568  ;;  %1038 = vmin.xlane.f32.xlu1 %v1016_v55  ;;  %v1013_v57 = vsel %vm997_vm3, 1.0, %v1722_v41  ;;  %v2066_v27 = vmul.f32 %v1567_v11, %v1987_v30 }
 0x2bb   :  { %1032 = vmin.xlane.f32.xlu0 %v1013_v57  ;;  %v2070_v13 = vmul.f32 %v1569_v56, %v1989_v31 }
 0x2bc   :  { %v919_v17 = vpop.xlane.xlu1 %918  ;;  %vm998_vm5 = vcmp.eq.f32.partialorder %v2066_v27, 0.0 }
 0x2bd   :  { %v1571_v58 = vpop.eup %1570  ;;  %v1330_v59 = vadd.f32 -1.0, %v919_v17  ;;  %v1014_v60 = vsel %vm998_vm5, 1.0, %v1722_v41  ;;  %vm1001_vm6 = vcmp.eq.f32.partialorder %v2070_v13, 0.0  ;;  %v879_v17 = vlaneseq }
 0x2be   :  { %v921_v52 = vpop.xlane.xlu0 %920  ;;  %1034 = vmin.xlane.f32.xlu1 %v1014_v60  ;;  %v2077_v4 = vmul.f32 %v1571_v58, %v1994_v35  ;;  %v1017_v7 = vsel %vm1001_vm6, 1.0, %v1722_v41 }
 0x2bf   :  { %v956_v2 = vmax.f32 %v1330_v59, 1e-08  ;;  %v1331_v30 = vadd.f32 -1.0, %v921_v52  ;;  %1028 = vmin.xlane.f32.xlu0 %v1011_v63 }
 0x2c0   :  { %v915_v31 = vpop.xlane.xlu1 %914  ;;  %vm999_vm7 = vcmp.eq.f32.partialorder %v2077_v4, 0.0 }
 0x2c1   :  { %1572 = vrsqrt.f32 %v956_v2  ;;  %v957_v5 = vmax.f32 %v1331_v30, 1e-08  ;;  %v1328_v62 = vadd.f32 -1.0, %v915_v31  ;;  %v1015_v35 = vsel %vm999_vm7, 1.0, %v1722_v41 }
 0x2c2   :  { %v917_v6 = vpop.xlane.xlu0 %916 }
 0x2c3   :  { %1574 = vrsqrt.f32 %v957_v5  ;;  %v954_v9 = vmax.f32 %v1328_v62, 1e-08  ;;  %v1329_v10 = vadd.f32 -1.0, %v917_v6  ;;  %1040 = vmin.xlane.f32.xlu0 %v1017_v7 }
 0x2c5   :  { %1576 = vrsqrt.f32 %v954_v9  ;;  %v955_v12 = vmax.f32 %v1329_v10, 1e-08  ;;  %v923_v14 = vpop.xlane.xlu1 %922 }
 0x2c6   :  { %v1332_v15 = vadd.f32 -1.0, %v923_v14 }
 0x2c7   :  { %1578 = vrsqrt.f32 %v955_v12  ;;  %1036 = vmin.xlane.f32.xlu0 %v1015_v35  ;;  %v925_v16 = vpop.xlane.xlu0 %924 }
 0x2c8   :  { %v958_v18 = vmax.f32 %v1332_v15, 1e-08  ;;  %v1333_v19 = vadd.f32 -1.0, %v925_v16 }
 0x2c9   :  { %v927_v20 = vpop.xlane.xlu1 %926 }
 0x2ca   :  { %1580 = vrsqrt.f32 %v958_v18  ;;  %v959_v21 = vmax.f32 %v1333_v19, 1e-08  ;;  %v1334_v22 = vadd.f32 -1.0, %v927_v20 }
 0x2cb   :  { %v1573_v23 = vpop.eup %1572  ;;  %v929_v24 = vpop.xlane.xlu0 %928 }
 0x2cc   :  { %1582 = vrsqrt.f32 %v959_v21  ;;  %v960_v25 = vmax.f32 %v1334_v22, 1e-08  ;;  %v1335_v26 = vadd.f32 -1.0, %v929_v24  ;;  %v2083_v28 = vmul.f32 %v1573_v23, %v2004_v44 }
 0x2cd   :  { %v1575_v29 = vpop.eup %1574 }
 0x2ce   :  { %1584 = vrsqrt.f32 %v960_v25  ;;  %v961_v32 = vmax.f32 %v1335_v26, 1e-08  ;;  %vm1004_vm8 = vcmp.eq.f32.partialorder %v2083_v28, 0.0  ;;  %v2087_v33 = vmul.f32 %v1575_v29, %v2010_v43 }
 0x2cf   :  { %v1577_v36 = vpop.eup %1576  ;;  %v1020_v34 = vsel %vm1004_vm8, 1.0, %v1722_v41 }
 0x2d0   :  { %1586 = vrsqrt.f32 %v961_v32  ;;  %1046 = vmin.xlane.f32.xlu1 %v1020_v34  ;;  %vm1005_vm9 = vcmp.eq.f32.partialorder %v2087_v33, 0.0  ;;  %v2092_v38 = vmul.f32 %v1577_v36, %v2008_v51 }
 0x2d1   :  { %v1579_v44 = vpop.eup %1578  ;;  %v1021_v39 = vsel %vm1005_vm9, 1.0, %v1722_v41 }
 0x2d2   :  { %1048 = vmin.xlane.f32.xlu0 %v1021_v39  ;;  %vm1002_vm10 = vcmp.eq.f32.partialorder %v2092_v38, 0.0  ;;  %v2097_v40 = vmul.f32 %v1579_v44, %v2014_v45 }
 0x2d3   :  { %v1018_v43 = vsel %vm1002_vm10, 1.0, %v1722_v41 }
 0x2d4   :  { %v1581_v42 = vpop.eup %1580  ;;  %1042 = vmin.xlane.f32.xlu1 %v1018_v43  ;;  %vm1003_vm11 = vcmp.eq.f32.partialorder %v2097_v40, 0.0 }
 0x2d5   :  { %v1019_v47 = vsel %vm1003_vm11, 1.0, %v1722_v41  ;;  %v2103_v51 = vmul.f32 %v1581_v42, %v2024_v61 }
 0x2d6   :  { %v1583_v8 = vpop.eup %1582  ;;  %1044 = vmin.xlane.f32.xlu0 %v1019_v47 }
 0x2d7   :  { %vm1006_vm12 = vcmp.eq.f32.partialorder %v2103_v51, 0.0  ;;  %v2107_v49 = vmul.f32 %v1583_v8, %v2030_v1 }
 0x2d8   :  { %v1585_v45 = vpop.eup %1584  ;;  %v1022_v53 = vsel %vm1006_vm12, 1.0, %v1722_v41 }
 0x2d9   :  { %1050 = vmin.xlane.f32.xlu1 %v1022_v53  ;;  %vm1007_vm13 = vcmp.eq.f32.partialorder %v2107_v49, 0.0  ;;  %v2112_v11 = vmul.f32 %v1585_v45, %v2028_v0  ;;  %v2122_v0 = vand.u32 127, %v879_v17 }
 0x2da   :  { %v1587_v55 = vpop.eup %1586  ;;  %v1023_v61 = vsel %vm1007_vm13, 1.0, %v1722_v41 }
 0x2db   :  { %1052 = vmin.xlane.f32.xlu0 %v1023_v61  ;;  %vm1008_vm14 = vcmp.eq.f32.partialorder %v2112_v11, 0.0  ;;  %v2117_v56 = vmul.f32 %v1587_v55, %v2034_v3  ;;  %vm881_vm0 = vcmp.lt.s32.totalorder %v2122_v0, 16 }
 0x2dc   :  { %v1024_v1 = vsel %vm1008_vm14, 1.0, %v1722_v41 }
 0x2dd   :  { %1054 = vmin.xlane.f32.xlu1 %v1024_v1  ;;  %vm1009_vm15 = vcmp.eq.f32.partialorder %v2117_v56, 0.0 }
 0x2de   :  { %v1025_v57 = vsel %vm1009_vm15, 1.0, %v1722_v41 }
 0x2df   :  { %1056 = vmin.xlane.f32.xlu0 %v1025_v57 }
 0x33f   :  { %v1031_v58 = vpop.xlane.xlu1 %1030 }
 0x340   :  { %vm1060_vm1 = vcmp.gt.f32.partialorder %v1031_v58, 0.0 }
 0x341   :  { %vm1108_vm2 = vmand %vm1060_vm1, %vm881_vm0 }
 0x342   :  { %v2128_v3 = vsel %vm1108_vm2, 1.0, %v2043_v37 }
 0x343   :  { %v1027_v59 = vpop.xlane.xlu1 %1026  ;;  %v1140_v60 = vmul.f32 %v2128_v3, %v2128_v3 }
 0x344   :  { %vm1058_vm3 = vcmp.gt.f32.partialorder %v1027_v59, 0.0 }
 0x345   :  { %vm1106_vm4 = vmand %vm1058_vm3, %vm881_vm0  ;;  %1158 = vadd.xlane.f32.xlu1 %v1140_v60 }
 0x346   :  { %v2135_v41 = vsel %vm1106_vm4, 1.0, %v2048_v46 }
 0x347   :  { %v1039_v52 = vpop.xlane.xlu1 %1038  ;;  %v1138_v63 = vmul.f32 %v2135_v41, %v2135_v41 }
 0x348   :  { %vm1064_vm5 = vcmp.gt.f32.partialorder %v1039_v52, 0.0  ;;  %v1033_v2 = vpop.xlane.xlu0 %1032 }
 0x349   :  { %vm1112_vm6 = vmand %vm1064_vm5, %vm881_vm0  ;;  %vm1061_vm7 = vcmp.gt.f32.partialorder %v1033_v2, 0.0  ;;  %1154 = vadd.xlane.f32.xlu1 %v1138_v63 }
 0x34a   :  { %vm1109_vm8 = vmand %vm1061_vm7, %vm881_vm0  ;;  %v2144_v37 = vsel %vm1112_vm6, 1.0, %v2053_v48 }
 0x34b   :  { %v1035_v30 = vpop.xlane.xlu1 %1034  ;;  %v1144_v46 = vmul.f32 %v2144_v37, %v2144_v37  ;;  %v2149_v31 = vsel %vm1109_vm8, 1.0, %v2056_v54 }
 0x34c   :  { %vm1062_vm9 = vcmp.gt.f32.partialorder %v1035_v30, 0.0  ;;  %v1029_v5 = vpop.xlane.xlu0 %1028  ;;  %v1141_v62 = vmul.f32 %v2149_v31, %v2149_v31 }
 0x34d   :  { %vm1110_vm10 = vmand %vm1062_vm9, %vm881_vm0  ;;  %vm1059_vm11 = vcmp.gt.f32.partialorder %v1029_v5, 0.0  ;;  %1166 = vadd.xlane.f32.xlu1 %v1144_v46 }
 0x34e   :  { %vm1107_vm12 = vmand %vm1059_vm11, %vm881_vm0  ;;  %1160 = vadd.xlane.f32.xlu0 %v1141_v62  ;;  %v2158_v48 = vsel %vm1110_vm10, 1.0, %v2066_v27 }
 0x34f   :  { %v1142_v54 = vmul.f32 %v2158_v48, %v2158_v48  ;;  %v2163_v6 = vsel %vm1107_vm12, 1.0, %v2059_v50 }
 0x350   :  { %v1041_v7 = vpop.xlane.xlu0 %1040  ;;  %v1139_v9 = vmul.f32 %v2163_v6, %v2163_v6 }
 0x351   :  { %vm1065_vm13 = vcmp.gt.f32.partialorder %v1041_v7, 0.0  ;;  %1162 = vadd.xlane.f32.xlu1 %v1142_v54 }
 0x352   :  { %vm1113_vm14 = vmand %vm1065_vm13, %vm881_vm0  ;;  %1156 = vadd.xlane.f32.xlu0 %v1139_v9 }
 0x353   :  { %v2170_v10 = vsel %vm1113_vm14, 1.0, %v2070_v13 }
 0x354   :  { %v1037_v27 = vpop.xlane.xlu0 %1036  ;;  %v1145_v12 = vmul.f32 %v2170_v10, %v2170_v10 }
 0x355   :  { %vm1063_vm15 = vcmp.gt.f32.partialorder %v1037_v27, 0.0 }
 0x356   :  { %vm1111_vm1 = vmand %vm1063_vm15, %vm881_vm0  ;;  %1168 = vadd.xlane.f32.xlu0 %v1145_v12 }
 0x357   :  { %v2177_v50 = vsel %vm1111_vm1, 1.0, %v2077_v4 }
 0x358   :  { %v1143_v14 = vmul.f32 %v2177_v50, %v2177_v50 }
 0x35a   :  { %1164 = vadd.xlane.f32.xlu0 %v1143_v14 }
 0x35d   :  { %v1047_v15 = vpop.xlane.xlu1 %1046 }
 0x35e   :  { %vm1068_vm2 = vcmp.gt.f32.partialorder %v1047_v15, 0.0 }
 0x35f   :  { %vm1116_vm3 = vmand %vm1068_vm2, %vm881_vm0  ;;  %v1049_v13 = vpop.xlane.xlu0 %1048 }
 0x360   :  { %vm1069_vm4 = vcmp.gt.f32.partialorder %v1049_v13, 0.0  ;;  %v2184_v35 = vsel %vm1116_vm3, 1.0, %v2083_v28 }
 0x361   :  { %vm1117_vm5 = vmand %vm1069_vm4, %vm881_vm0  ;;  %v1043_v16 = vpop.xlane.xlu1 %1042  ;;  %v1148_v4 = vmul.f32 %v2184_v35, %v2184_v35 }
 0x362   :  { %vm1066_vm6 = vcmp.gt.f32.partialorder %v1043_v16, 0.0  ;;  %v2191_v18 = vsel %vm1117_vm5, 1.0, %v2087_v33 }
 0x363   :  { %vm1114_vm7 = vmand %vm1066_vm6, %vm881_vm0  ;;  %1174 = vadd.xlane.f32.xlu1 %v1148_v4  ;;  %v1045_v19 = vpop.xlane.xlu0 %1044  ;;  %v1149_v20 = vmul.f32 %v2191_v18, %v2191_v18 }
 0x364   :  { %vm1067_vm8 = vcmp.gt.f32.partialorder %v1045_v19, 0.0  ;;  %v2198_v21 = vsel %vm1114_vm7, 1.0, %v2092_v38 }
 0x365   :  { %vm1115_vm9 = vmand %vm1067_vm8, %vm881_vm0  ;;  %1176 = vadd.xlane.f32.xlu0 %v1149_v20  ;;  %v1146_v22 = vmul.f32 %v2198_v21, %v2198_v21 }
 0x366   :  { %v1051_v23 = vpop.xlane.xlu1 %1050  ;;  %v2205_v24 = vsel %vm1115_vm9, 1.0, %v2097_v40 }
 0x367   :  { %vm1070_vm10 = vcmp.gt.f32.partialorder %v1051_v23, 0.0  ;;  %1170 = vadd.xlane.f32.xlu1 %v1146_v22  ;;  %v1147_v25 = vmul.f32 %v2205_v24, %v2205_v24 }
 0x368   :  { %vm1118_vm11 = vmand %vm1070_vm10, %vm881_vm0  ;;  %v1053_v26 = vpop.xlane.xlu0 %1052 }
 0x369   :  { %vm1071_vm12 = vcmp.gt.f32.partialorder %v1053_v26, 0.0  ;;  %1172 = vadd.xlane.f32.xlu0 %v1147_v25  ;;  %v2212_v28 = vsel %vm1118_vm11, 1.0, %v2103_v51 }
 0x36a   :  { %vm1119_vm13 = vmand %vm1071_vm12, %vm881_vm0  ;;  %v1055_v29 = vpop.xlane.xlu1 %1054  ;;  %v1150_v32 = vmul.f32 %v2212_v28, %v2212_v28 }
 0x36b   :  { %vm1072_vm14 = vcmp.gt.f32.partialorder %v1055_v29, 0.0  ;;  %v2219_v33 = vsel %vm1119_vm13, 1.0, %v2107_v49 }
 0x36c   :  { %vm1120_vm15 = vmand %vm1072_vm14, %vm881_vm0  ;;  %1178 = vadd.xlane.f32.xlu1 %v1150_v32  ;;  %v1057_v36 = vpop.xlane.xlu0 %1056  ;;  %v1151_v34 = vmul.f32 %v2219_v33, %v2219_v33 }
 0x36d   :  { %vm1073_vm1 = vcmp.gt.f32.partialorder %v1057_v36, 0.0  ;;  %v2226_v38 = vsel %vm1120_vm15, 1.0, %v2112_v11 }
 0x36e   :  { %vm1121_vm2 = vmand %vm1073_vm1, %vm881_vm0  ;;  %1180 = vadd.xlane.f32.xlu0 %v1151_v34  ;;  %v1152_v44 = vmul.f32 %v2226_v38, %v2226_v38  ;;  %vm1234_vm0 = vcmp.eq.s32.totalorder %v2122_v0, 16 }
 0x36f   :  { %v2233_v39 = vsel %vm1121_vm2, 1.0, %v2117_v56 }
 0x370   :  { %1182 = vadd.xlane.f32.xlu1 %v1152_v44  ;;  %v1153_v40 = vmul.f32 %v2233_v39, %v2233_v39 }
 0x372   :  { %1184 = vadd.xlane.f32.xlu0 %v1153_v40 }
 0x3d2   :  { %v1159_v43 = vpop.xlane.xlu1 %1158 }
 0x3d3   :  { %v1188_v42 = vmax.f32 %v1159_v43, 1e-16 }
 0x3d5   :  { %1588 = vrsqrt.f32 %v1188_v42 }
 0x3d6   :  { %v1155_v47 = vpop.xlane.xlu1 %1154 }
 0x3d7   :  { %v1186_v51 = vmax.f32 %v1155_v47, 1e-16 }
 0x3d9   :  { %1590 = vrsqrt.f32 %v1186_v51 }
 0x3da   :  { %v1167_v8 = vpop.xlane.xlu1 %1166 }
 0x3db   :  { %v1192_v49 = vmax.f32 %v1167_v8, 1e-16  ;;  %v1161_v45 = vpop.xlane.xlu0 %1160 }
 0x3dc   :  { %v1189_v53 = vmax.f32 %v1161_v45, 1e-16 }
 0x3dd   :  { %1592 = vrsqrt.f32 %v1192_v49 }
 0x3de   :  { %1594 = vrsqrt.f32 %v1189_v53  ;;  %v1163_v11 = vpop.xlane.xlu1 %1162 }
 0x3df   :  { %v1589_v55 = vpop.eup %1588  ;;  %v1190_v61 = vmax.f32 %v1163_v11, 1e-16  ;;  %v1157_v56 = vpop.xlane.xlu0 %1156 }
 0x3e0   :  { %v1220_v1 = vmul.f32 %v1589_v55, %v2128_v3  ;;  %v1187_v57 = vmax.f32 %v1157_v56, 1e-16 }
 0x3e1   :  { %1596 = vrsqrt.f32 %v1190_v61 }
 0x3e2   :  { %v1237_v17 = vsel %vm1234_vm0, 1.0, %v1220_v1  ;;  %1598 = vrsqrt.f32 %v1187_v57 }
 0x3e3   :  { %v1591_v58 = vpop.eup %1590  ;;  %1253 = vst [vmem:[#allocation9 + $0x10] sm:$0xff] %v1237_v17  ;;  %v1169_v59 = vpop.xlane.xlu0 %1168 }
 0x3e4   :  { %v1218_v60 = vmul.f32 %v1591_v58, %v2135_v41  ;;  %v1193_v52 = vmax.f32 %v1169_v59, 1e-16 }
 0x3e6   :  { %v1235_v63 = vsel %vm1234_vm0, 1.0, %v1218_v60  ;;  %1600 = vrsqrt.f32 %v1193_v52 }
 0x3e7   :  { %v1593_v2 = vpop.eup %1592  ;;  %1251 = vst [vmem:[#allocation9] sm:$0xff] %v1235_v63  ;;  %v1165_v30 = vpop.xlane.xlu0 %1164 }
 0x3e8   :  { %v1595_v3 = vpop.eup %1594  ;;  %v1224_v46 = vmul.f32 %v1593_v2, %v2144_v37  ;;  %v1191_v5 = vmax.f32 %v1165_v30, 1e-16 }
 0x3e9   :  { %v1221_v62 = vmul.f32 %v1595_v3, %v2149_v31 }
 0x3ea   :  { %v1241_v54 = vsel %vm1234_vm0, 1.0, %v1224_v46  ;;  %1602 = vrsqrt.f32 %v1191_v5 }
 0x3eb   :  { %v1597_v7 = vpop.eup %1596  ;;  %1257 = vst [vmem:[#allocation9 + $0x30] sm:$0xff] %v1241_v54  ;;  %v1238_v41 = vsel %vm1234_vm0, 1.0, %v1221_v62 }
 0x3ec   :  { %v1599_v9 = vpop.eup %1598  ;;  %1254 = vst [vmem:[#allocation9 + $0x18] sm:$0xff] %v1238_v41  ;;  %v1222_v27 = vmul.f32 %v1597_v7, %v2158_v48 }
 0x3ed   :  { %v1219_v12 = vmul.f32 %v1599_v9, %v2163_v6 }
 0x3ee   :  { %v1239_v37 = vsel %vm1234_vm0, 1.0, %v1222_v27 }
 0x3ef   :  { %1255 = vst [vmem:[#allocation9 + $0x20] sm:$0xff] %v1239_v37  ;;  %v1236_v31 = vsel %vm1234_vm0, 1.0, %v1219_v12 }
 0x3f0   :  { %v1601_v14 = vpop.eup %1600  ;;  %1252 = vst [vmem:[#allocation9 + $0x8] sm:$0xff] %v1236_v31  ;;  %v1175_v15 = vpop.xlane.xlu1 %1174 }
 0x3f1   :  { %v1225_v13 = vmul.f32 %v1601_v14, %v2170_v10  ;;  %v1196_v16 = vmax.f32 %v1175_v15, 1e-16 }
 0x3f2   :  { %v1177_v4 = vpop.xlane.xlu0 %1176 }
 0x3f3   :  { %v1242_v19 = vsel %vm1234_vm0, 1.0, %v1225_v13  ;;  %1604 = vrsqrt.f32 %v1196_v16  ;;  %v1197_v48 = vmax.f32 %v1177_v4, 1e-16 }
 0x3f4   :  { %v1603_v6 = vpop.eup %1602  ;;  %1258 = vst [vmem:[#allocation9 + $0x38] sm:$0xff] %v1242_v19  ;;  %v1171_v20 = vpop.xlane.xlu1 %1170 }
 0x3f5   :  { %v1223_v22 = vmul.f32 %v1603_v6, %v2177_v50  ;;  %1606 = vrsqrt.f32 %v1197_v48  ;;  %v1194_v23 = vmax.f32 %v1171_v20, 1e-16 }
 0x3f6   :  { %v1173_v25 = vpop.xlane.xlu0 %1172 }
 0x3f7   :  { %v1240_v26 = vsel %vm1234_vm0, 1.0, %v1223_v22  ;;  %1608 = vrsqrt.f32 %v1194_v23  ;;  %v1195_v10 = vmax.f32 %v1173_v25, 1e-16 }
 0x3f8   :  { %1256 = vst [vmem:[#allocation9 + $0x28] sm:$0xff] %v1240_v26 }
 0x3f9   :  { %1610 = vrsqrt.f32 %v1195_v10  ;;  %v1179_v29 = vpop.xlane.xlu1 %1178 }
 0x3fa   :  { %v1198_v32 = vmax.f32 %v1179_v29, 1e-16 }
 0x3fb   :  { %v1181_v36 = vpop.xlane.xlu0 %1180 }
 0x3fc   :  { %1612 = vrsqrt.f32 %v1198_v32  ;;  %v1199_v34 = vmax.f32 %v1181_v36, 1e-16 }
 0x3fd   :  { %v1605_v44 = vpop.eup %1604  ;;  %v1183_v40 = vpop.xlane.xlu1 %1182 }
 0x3fe   :  { %v1228_v43 = vmul.f32 %v1605_v44, %v2184_v35  ;;  %1614 = vrsqrt.f32 %v1199_v34  ;;  %v1200_v50 = vmax.f32 %v1183_v40, 1e-16 }
 0x3ff   :  { %v1607_v42 = vpop.eup %1606  ;;  %v1185_v47 = vpop.xlane.xlu0 %1184 }
 0x400   :  { %v1245_v51 = vsel %vm1234_vm0, 1.0, %v1228_v43  ;;  %v1229_v8 = vmul.f32 %v1607_v42, %v2191_v18  ;;  %1616 = vrsqrt.f32 %v1200_v50  ;;  %v1201_v49 = vmax.f32 %v1185_v47, 1e-16 }
 0x401   :  { %v1609_v45 = vpop.eup %1608  ;;  %1261 = vst [vmem:[#allocation9 + $0x50] sm:$0xff] %v1245_v51 }
 0x402   :  { %v1246_v53 = vsel %vm1234_vm0, 1.0, %v1229_v8  ;;  %v1226_v11 = vmul.f32 %v1609_v45, %v2198_v21  ;;  %1618 = vrsqrt.f32 %v1201_v49 }
 0x403   :  { %v1611_v35 = vpop.eup %1610  ;;  %1262 = vst [vmem:[#allocation9 + $0x58] sm:$0xff] %v1246_v53 }
 0x404   :  { %v1243_v55 = vsel %vm1234_vm0, 1.0, %v1226_v11  ;;  %v1227_v61 = vmul.f32 %v1611_v35, %v2205_v24 }
 0x405   :  { %1259 = vst [vmem:[#allocation9 + $0x40] sm:$0xff] %v1243_v55 }
 0x406   :  { %v1613_v56 = vpop.eup %1612  ;;  %v1244_v18 = vsel %vm1234_vm0, 1.0, %v1227_v61 }
 0x407   :  { %1260 = vst [vmem:[#allocation9 + $0x48] sm:$0xff] %v1244_v18  ;;  %v1230_v1 = vmul.f32 %v1613_v56, %v2212_v28 }
 0x408   :  { %v1615_v57 = vpop.eup %1614 }
 0x409   :  { %v1247_v21 = vsel %vm1234_vm0, 1.0, %v1230_v1  ;;  %v1231_v17 = vmul.f32 %v1615_v57, %v2219_v33 }
 0x40a   :  { %v1617_v58 = vpop.eup %1616  ;;  %1263 = vst [vmem:[#allocation9 + $0x60] sm:$0xff] %v1247_v21 }
 0x40b   :  { %v1248_v59 = vsel %vm1234_vm0, 1.0, %v1231_v17  ;;  %v1232_v24 = vmul.f32 %v1617_v58, %v2226_v38 }
 0x40c   :  { %v1619_v60 = vpop.eup %1618  ;;  %1264 = vst [vmem:[#allocation9 + $0x68] sm:$0xff] %v1248_v59 }
 0x40d   :  { %v1249_v28 = vsel %vm1234_vm0, 1.0, %v1232_v24  ;;  %v1233_v52 = vmul.f32 %v1619_v60, %v2233_v39 }
 0x40e   :  { %1265 = vst [vmem:[#allocation9 + $0x70] sm:$0xff] %v1249_v28 }
 0x40f   :  { %v1250_v33 = vsel %vm1234_vm0, 1.0, %v1233_v52 }
 0x410   :  { %1266 = vst [vmem:[#allocation9 + $0x78] sm:$0xff] %v1250_v33 }
 0x411   :  { %1697 = shalt.err (!%p1694_p0)
}
 0x412   :  { %s1698_s13 = scalar_lea.hbm %s2308_s7, 2048 }
 0x413   :  { %p1699_p1 = scmp.ne.s32.totalorder %s2308_s7, %s1698_s13  ;;  %p1702_p2 = scmp.lt.u32.totalorder %s1698_s13, %s2308_s7 }
 0x415   :  { %p1704_p3 = pnand %p1702_p2, %p1699_p1 }
 0x417   :  { %1707 = shalt.err (!%p1704_p3)
}
 0x418   :  { %1278 = dma.vmem_to_hbm [thread:$0]  %s1273_s6, 2048, %s2308_s7, [#allocation5], %s1718_s4, %s1718_s4, %s1719_s25  }
 0x419   :  { %1712 = dma.done.wait [#allocation5], 2048  }
 0x41a   :  { %1713 = vsyncadd [#allocation5], 4294965248 }
 0x41b   :  { %1282 = vsyncpa [#allocation4], 1 }
 0x41c   :  { %1283 = vsyncpa [#allocation7], 1 }
 0x41d   :  { %1284 = vsyncpa [#allocation5], 1 }

</bundles_post_ra>
